<compile_context>
chip_gen: v6e
topology: v6e:2x2x1
jax: 0.10.0
libtpu: 0.0.40
codegen_flags: <defaults>
</compile_context>

<pallas_src>
import jax
import jax.numpy as jnp
from jax.experimental import pallas as pl
from jax.experimental.pallas import tpu as pltpu

EPS = 1e-5


def _add_conv1x1_bn_kernel(x1_ref, x2_ref, w_ref, g_ref, b_ref, o_ref):
    # x1_ref, x2_ref : (M, K)   f32   M = N*H*W rows, K = C_in
    # w_ref          : (TN, K)  bf16  output-channel tile of the (C_out, C_in) weight
    # g_ref, b_ref   : (1, TN)  f32   batchnorm gamma / beta tile
    # o_ref          : (M, TN)  f32
    x = (x1_ref[...] + x2_ref[...]).astype(jnp.bfloat16)        # elementwise add (VPU)
    # 1x1 conv == matmul; weight kept (C_out, C_in): contract K with K (no transpose copy).
    y = jax.lax.dot_general(
        x, w_ref[...],
        dimension_numbers=(((1,), (1,)), ((), ())),
        preferred_element_type=jnp.float32,
    )                                                           # (M, TN) f32 on the MXU

    # BatchNorm2d training-mode forward: per-channel batch stats over N,H,W (rows).
    # Single reduction pass: E[y], E[y^2]; biased variance, clamped for stability.
    m = y.shape[0]
    mean = jnp.sum(y, axis=0, keepdims=True) * (1.0 / m)        # (1, TN)
    mean_sq = jnp.sum(y * y, axis=0, keepdims=True) * (1.0 / m)
    var = jnp.maximum(mean_sq - mean * mean, 0.0)
    inv = jax.lax.rsqrt(var + EPS)
    o_ref[...] = (y - mean) * (inv * g_ref[...]) + b_ref[...]


def prepare_conv_weight(weight):
    """One-time parameter prep: (C_out, C_in, 1, 1) f32 -> (C_out, C_in) bf16.

    Done once and amortized across forward passes; removes the per-call weight
    transpose and halves the dominant weight HBM traffic.
    """
    cout, cin = weight.shape[0], weight.shape[1]
    return weight.reshape(cout, cin).astype(jnp.bfloat16)


def add_conv1x1_bn(x618, x604, w2d, gamma, beta, *, tn=384):
    """Fused (x618 + x604) -> 1x1 conv (no bias) -> BatchNorm2d (batch stats).

    x618, x604 : (N, C_in, H, W) f32
    w2d        : (C_out, C_in)   bf16 (from prepare_conv_weight)
    gamma,beta : (C_out,)        f32
    returns    : (N, C_out, H, W) f32
    """
    N, C, H, W = x618.shape
    Cout = w2d.shape[0]
    M = N * H * W
    assert Cout % tn == 0 and tn % 128 == 0, (Cout, tn)

    # NCHW -> (M, C_in): channels land on the 128-lane axis (tiny copies, ~75 KB each).
    x1 = jnp.transpose(x618, (0, 2, 3, 1)).reshape(M, C)
    x2 = jnp.transpose(x604, (0, 2, 3, 1)).reshape(M, C)
    g = gamma.reshape(1, Cout).astype(jnp.float32)
    b = beta.reshape(1, Cout).astype(jnp.float32)

    out = pl.pallas_call(
        _add_conv1x1_bn_kernel,
        out_shape=jax.ShapeDtypeStruct((M, Cout), jnp.float32),
        grid=(Cout // tn,),
        in_specs=[
            pl.BlockSpec((M, C), lambda j: (0, 0)),     # activations stay resident across grid
            pl.BlockSpec((M, C), lambda j: (0, 0)),
            pl.BlockSpec((tn, C), lambda j: (j, 0)),    # weight tile: double-buffered DMA
            pl.BlockSpec((1, tn), lambda j: (0, j)),
            pl.BlockSpec((1, tn), lambda j: (0, j)),
        ],
        out_specs=pl.BlockSpec((M, tn), lambda j: (0, j)),
        compiler_params=pltpu.CompilerParams(
            dimension_semantics=("parallel",),          # per-channel tiles independent (megacore)
        ),
    )(x1, x2, w2d, g, b)

    # (M, C_out) -> NCHW to match the PyTorch module's interface.
    # TODO(synk): skip this transpose if the downstream consumer accepts NHWC.
    return jnp.transpose(out.reshape(N, H, W, Cout), (0, 3, 1, 2))


def _reference(x618, x604, w2d, gamma, beta):
    # Pure-JAX reference with the same precision choices as the kernel
    # (bf16 operands into the matmul, f32 accumulation, f32 BN statistics).
    N, C, H, W = x618.shape
    Cout = w2d.shape[0]
    xm = jnp.transpose(x618 + x604, (0, 2, 3, 1)).reshape(-1, C).astype(jnp.bfloat16)
    y = jax.lax.dot_general(
        xm, w2d.astype(jnp.bfloat16),
        dimension_numbers=(((1,), (1,)), ((), ())),
        preferred_element_type=jnp.float32,
    )                                                           # (M, Cout) f32
    mean = jnp.mean(y, axis=0)
    var = jnp.mean((y - mean) ** 2, axis=0)                     # biased variance (training-mode BN)
    yn = (y - mean) * jax.lax.rsqrt(var + EPS) * gamma + beta
    return jnp.transpose(yn.reshape(N, H, W, Cout), (0, 3, 1, 2))


if __name__ == "__main__":
    # Module shapes: inputs (1, 384, 7, 7), conv 384 -> 2304 (1x1, no bias).
    N, Cin, H, W = 1, 384, 7, 7
    Cout = 2304

    key = jax.random.PRNGKey(0)
    k1, k2, k3, k4, k5 = jax.random.split(key, 5)
    x618 = jax.random.normal(k1, (N, Cin, H, W), dtype=jnp.float32)
    x604 = jax.random.normal(k2, (N, Cin, H, W), dtype=jnp.float32)
    weight = jax.random.normal(k3, (Cout, Cin, 1, 1), dtype=jnp.float32) * 0.05
    gamma = 1.0 + 0.1 * jax.random.normal(k4, (Cout,), dtype=jnp.float32)
    beta = 0.1 * jax.random.normal(k5, (Cout,), dtype=jnp.float32)

    # One-time parameter prep (amortized over forward passes).
    w2d = prepare_conv_weight(weight)

    out = add_conv1x1_bn(x618, x604, w2d, gamma, beta)
    out = jax.block_until_ready(out)

    ref = _reference(x618, x604, w2d, gamma, beta)
    assert out.shape == (N, Cout, H, W), out.shape
    err = float(jnp.max(jnp.abs(out - ref)))
    assert jnp.allclose(out, ref, atol=1e-3, rtol=1e-3), f"mismatch vs reference, max err {err}"

    print("KERNEL_OK")
</pallas_src>

<mosaic_0001>
module attributes {stable_mosaic.version = 11 : i64} {
  func.func @_add_conv1x1_bn_kernel(%arg0: i32, %arg1: memref<49x384xf32, #tpu.memory_space<vmem>>, %arg2: memref<49x384xf32, #tpu.memory_space<vmem>>, %arg3: memref<384x384xbf16, #tpu.memory_space<vmem>>, %arg4: memref<1x384xf32, #tpu.memory_space<vmem>>, %arg5: memref<1x384xf32, #tpu.memory_space<vmem>>, %arg6: memref<49x384xf32, #tpu.memory_space<vmem>>) attributes {dimension_semantics = [#tpu.dimension_semantics<parallel>], iteration_bounds = array<i64: 6>, scalar_prefetch = 0 : i64, scratch_operands = 0 : i64, tpu.core_type = #tpu.core_type<tc>, window_params = [{pipeline_mode = #tpu.pipeline_mode<synchronous>, transform_indices = @transform_0, window_bounds = array<i64: 49, 384>}, {pipeline_mode = #tpu.pipeline_mode<synchronous>, transform_indices = @transform_1, window_bounds = array<i64: 49, 384>}, {transform_indices = @transform_2, window_bounds = array<i64: 384, 384>}, {transform_indices = @transform_3, window_bounds = array<i64: 1, 384>}, {transform_indices = @transform_4, window_bounds = array<i64: 1, 384>}, {transform_indices = @transform_5, window_bounds = array<i64: 49, 384>}]} {
    %c0 = arith.constant 0 : index
    %c0_0 = arith.constant 0 : index
    %0 = vector.load %arg1[%c0, %c0_0] : memref<49x384xf32, #tpu.memory_space<vmem>>, vector<49x384xf32>
    %c0_1 = arith.constant 0 : index
    %c0_2 = arith.constant 0 : index
    %1 = vector.load %arg2[%c0_1, %c0_2] : memref<49x384xf32, #tpu.memory_space<vmem>>, vector<49x384xf32>
    %2 = arith.addf %0, %1 : vector<49x384xf32>
    %3 = arith.truncf %2 : vector<49x384xf32> to vector<49x384xbf16>
    %c0_3 = arith.constant 0 : index
    %c0_4 = arith.constant 0 : index
    %4 = vector.load %arg3[%c0_3, %c0_4] : memref<384x384xbf16, #tpu.memory_space<vmem>>, vector<384x384xbf16>
    %cst = arith.constant dense<0.000000e+00> : vector<49x384xf32>
    %5 = tpu.matmul %3, %4, %cst {dimension_numbers = #tpu.dot_dimension_numbers<[1], [1], [0], [0], [0, 0, 1, 0], [], []>} : vector<49x384xbf16>, vector<384x384xbf16>, vector<49x384xf32> -> vector<49x384xf32>
    %cst_5 = arith.constant dense<0.000000e+00> : vector<384xf32>
    %6 = vector.multi_reduction <add>, %5, %cst_5 [0] : vector<49x384xf32> to vector<384xf32>
    %7 = vector.shape_cast %6 : vector<384xf32> to vector<1x384xf32>
    %cst_6 = arith.constant 0.0204081628 : f32
    %8 = vector.broadcast %cst_6 : f32 to vector<1x384xf32>
    %9 = arith.mulf %7, %8 : vector<1x384xf32>
    %10 = arith.mulf %5, %5 : vector<49x384xf32>
    %cst_7 = arith.constant dense<0.000000e+00> : vector<384xf32>
    %11 = vector.multi_reduction <add>, %10, %cst_7 [0] : vector<49x384xf32> to vector<384xf32>
    %12 = vector.shape_cast %11 : vector<384xf32> to vector<1x384xf32>
    %cst_8 = arith.constant 0.0204081628 : f32
    %13 = vector.broadcast %cst_8 : f32 to vector<1x384xf32>
    %14 = arith.mulf %12, %13 : vector<1x384xf32>
    %15 = arith.mulf %9, %9 : vector<1x384xf32>
    %16 = arith.subf %14, %15 : vector<1x384xf32>
    %cst_9 = arith.constant 0.000000e+00 : f32
    %17 = vector.broadcast %cst_9 : f32 to vector<1x384xf32>
    %18 = arith.maximumf %16, %17 : vector<1x384xf32>
    %cst_10 = arith.constant 9.99999974E-6 : f32
    %19 = vector.broadcast %cst_10 : f32 to vector<1x384xf32>
    %20 = arith.addf %18, %19 : vector<1x384xf32>
    %21 = math.rsqrt %20 : vector<1x384xf32>
    %22 = vector.broadcast %9 : vector<1x384xf32> to vector<49x384xf32>
    %23 = arith.subf %5, %22 : vector<49x384xf32>
    %c0_11 = arith.constant 0 : index
    %c0_12 = arith.constant 0 : index
    %24 = vector.load %arg4[%c0_11, %c0_12] : memref<1x384xf32, #tpu.memory_space<vmem>>, vector<1x384xf32>
    %25 = arith.mulf %21, %24 : vector<1x384xf32>
    %26 = vector.broadcast %25 : vector<1x384xf32> to vector<49x384xf32>
    %27 = arith.mulf %23, %26 : vector<49x384xf32>
    %c0_13 = arith.constant 0 : index
    %c0_14 = arith.constant 0 : index
    %28 = vector.load %arg5[%c0_13, %c0_14] : memref<1x384xf32, #tpu.memory_space<vmem>>, vector<1x384xf32>
    %29 = vector.broadcast %28 : vector<1x384xf32> to vector<49x384xf32>
    %30 = arith.addf %27, %29 : vector<49x384xf32>
    %c0_15 = arith.constant 0 : index
    %c0_16 = arith.constant 0 : index
    %31 = vector.load %arg6[%c0_15, %c0_16] : memref<49x384xf32, #tpu.memory_space<vmem>>, vector<49x384xf32>
    tpu.vector_store %arg6[%c0_15, %c0_16], %30 {strides = array<i32>} : memref<49x384xf32, #tpu.memory_space<vmem>>, vector<49x384xf32>,
    return
  }
  func.func @transform_0(%arg0: i32) -> (i32, i32) {
    %c0_i32 = arith.constant 0 : i32
    %c0_i32_0 = arith.constant 0 : i32
    %c0_i32_1 = arith.constant 0 : i32
    return %c0_i32, %c0_i32_0 : i32, i32
  }
  func.func @transform_1(%arg0: i32) -> (i32, i32) {
    %c0_i32 = arith.constant 0 : i32
    %c0_i32_0 = arith.constant 0 : i32
    %c0_i32_1 = arith.constant 0 : i32
    return %c0_i32, %c0_i32_0 : i32, i32
  }
  func.func @transform_2(%arg0: i32) -> (i32, i32) {
    %c0_i32 = arith.constant 0 : i32
    %c0_i32_0 = arith.constant 0 : i32
    return %arg0, %c0_i32 : i32, i32
  }
  func.func @transform_3(%arg0: i32) -> (i32, i32) {
    %c0_i32 = arith.constant 0 : i32
    %c0_i32_0 = arith.constant 0 : i32
    return %c0_i32, %arg0 : i32, i32
  }
  func.func @transform_4(%arg0: i32) -> (i32, i32) {
    %c0_i32 = arith.constant 0 : i32
    %c0_i32_0 = arith.constant 0 : i32
    return %c0_i32, %arg0 : i32, i32
  }
  func.func @transform_5(%arg0: i32) -> (i32, i32) {
    %c0_i32 = arith.constant 0 : i32
    %c0_i32_0 = arith.constant 0 : i32
    return %c0_i32, %arg0 : i32, i32
  }
}

</mosaic_0001>

<bundles_post_ra>
// kernel: tpu_custom_call.1
= control target key start
LH: loop header
LB: loop body
LE: loop exit
PB: predicated region body
PF: predicated region fallthrough
CT: control target
= control target key end

     0   :  { %s2797_s0 = inlined_call_operand.hbm [shape: f32[49,384], index: 0, kind: input, shape index: {}]   ;;  %s2798_s1 = inlined_call_operand.hbm [shape: f32[49,384], index: 1, kind: input, shape index: {}]   ;;  %s2799_s2 = inlined_call_operand.hbm [shape: bf16[2304,384], index: 2, kind: input, shape index: {}]   ;;  %s2800_s3 = inlined_call_operand.hbm [shape: f32[1,2304], index: 3, kind: input, shape index: {}]   ;;  %s2801_s4 = inlined_call_operand.hbm [shape: f32[1,2304], index: 4, kind: input, shape index: {}]   ;;  %s2802_s5 = inlined_call_operand.hbm [shape: f32[49,2304], index: 5, kind: output, shape index: {}]  }
   0x1   :  { %2815 = sst [smem:[#allocation18_spill]] %s2797_s0 }
   0x2   :  { %2816 = sst [smem:[#allocation19_spill]] %s2799_s2 }
   0x3   :  { %10 = vsyncpa [#allocation3], 0 }
   0x4   :  { %11 = vsyncpa [#allocation6], 0 }
   0x5   :  { %12 = vsyncpa [#allocation4], 0 }
   0x6   :  { %14 = vsyncpa [#allocation4 + $0x1], 0  ;;  %s2183_s18 = smov 0   ;;  %s2185_s19 = smov 0  }
   0x7   :  { %s2187_s20 = smov 0   ;;  %s2189_s21 = smov 0  }
   0x8 LB: > { %2817 = sst [smem:[#allocation15_spill]] %s2134_s20  ;;  %s2204_s22 = sadd.s32 4294967295, %s2138_s21   ;;  %s2138_s21 = sphi %s2189_s21, %s2844_s21   ;;  %s2134_s20 = sphi %s2187_s20, %s2846_s20   ;;  %s2130_s19 = sphi %s2185_s19, %s2848_s19   ;;  %s2126_s18 = sphi %s2183_s18, %s2847_s18  }
   0x9   : > { %s1571_s23 = sadd.s32 4294967294, %s2138_s21   ;;  %s2208_s24 = sadd.s32 1, %s2138_s21  }
   0xa   : > { %2818 = sst [smem:[#allocation16_spill]] %s2208_s24  ;;  %s69_s25 = sadd.s32 1, %s2134_s20 }
   0xb   : > { %s66_s26 = ssub.s32 %s2138_s21, %s2208_s24  ;;  %p76_p0 = scmp.ne.s32.totalorder %s2134_s20, %s2130_s19 }
   0xc   : > { %p67_p1 = scmp.eq.s32.totalorder %s66_s26, 0  ;;  %p77_p2 = scmp.eq.s32.totalorder %s2138_s21, 0 }
   0xd   : > { %p82_p3 = scmp.ne.s32.totalorder %s2130_s19, %s2126_s18  ;;  %p2807_p4 = scmp.eq.s32.totalorder %s2204_s22, 0 }
   0xe   : > { %s2220_s27 = scalar_select %p67_p1, %s2134_s20, %s69_s25  }
   0xf   : > { %p2222_p5 = por %p77_p2, %p76_p0  ;;  %p2228_p6 = por %p2807_p4, %p82_p3 }
  0x10   : > { %2819 = sst [smem:[#allocation17_spill]] %s2220_s27  ;;  %p158_p7 = scmp.eq.s32.totalorder %s2204_s22, 5 }
  0x11   : > { %s2821_s29 = scalar_select %p2228_p6, 1, 0 }
  0x12   : > { %p164_p8 = scmp.eq.s32.totalorder %s1571_s23, 5  ;;  %p1572_p9 = scmp.ge.s32.totalorder %s2138_s21, 1 }
  0x13   : > { %p171_p10 = scmp.lt.s32.totalorder %s2138_s21, 7  ;;  %p2235_p11 = por %p158_p7, %p76_p0 }
  0x14   : > { %p2239_p12 = por %p164_p8, %p82_p3  ;;  %s2140_s8 = smov [#allocation2]  }
  0x15   : > { %s2822_s30 = scalar_select %p2235_p11, 1, 0 }
  0x16   : > { %s2823_s6 = scalar_select %p2239_p12, 1, 0 }
  0x17   : > { %p2243_p13 = pnand %p1572_p9, %p171_p10  ;;  %s183_s9 = sshll.u32 %s2140_s8, 4  ;;  %s184_s9 = int_to_ptr.vmem [resolvable:$true] %s183_s9 }
  0x18   : > { %p1782_p0 = scmp.lt.s32.totalorder %s2138_s21, 6  ;;  %s210_s11 = sand.u32 1, %s2138_s21  }
  0x19   : > { %s2824_s7 = scalar_select %p2243_p13, 1, 0 }
  0x1a   : > { %p1759_p1 = pneg %p2243_p13  ;;  %s1941_s12 = scalar_lea.vmem %s184_s9, 2688 }
  0x1b   : > { %p1942_p7 = scmp.ne.s32.totalorder %s184_s9, %s1941_s12  ;;  %p1949_p10 = scmp.lt.s32.totalorder %s184_s9, %s184_s9 }
  0x1c   : > { %p2251_p2 = pnand %p1759_p1, %p2807_p4  ;;  %p1950_p12 = scmp.lt.s32.totalorder %s1941_s12, %s1941_s12 }
  0x1e   : > { %s2825_s10 = scalar_select %p2251_p2, 1, 0 }
  0x1f   : > { %p2808_p3 = pneg %p2251_p2  ;;  %p1951_p11 = por %p1950_p12, %p1949_p10 }
  0x21   : > { %p1944_p8 = pnand %p1942_p7, %p2808_p3 }
  0x23   : > { %p1945_p9 = pneg %p1944_p8 }
  0x25   : > { %p1952_p6 = pnand %p1951_p11, %p1945_p9 }
  0x27   : > { %1955 = shalt.err (!%p1952_p6)
}
  0x28   : > { %s2805_s13 = smov 384   ;;  %s2806_s14 = smov 24  }
  0x29   : > { %s2826_s0 = sld [smem:[#allocation18_spill]]  ;;  %p2274_p6 = pnand %p1782_p0, %p2222_p5 }
  0x2a   : > { %s212_s23 = sand.u32 1, %s2134_s20   ;;  %s1783_s26 = smul.u32 9216, %s2138_s21 }
  0x2b   : > { %s1736_s25 = smul.u32 576, %s212_s23  ;;  %s2828_s2 = sld [smem:[#allocation19_spill]] }
  0x2c   : > { %s2290_s16 = scalar_lea.sflag [#allocation3], %s210_s11  ;;  %p2296_p11 = pneg %p2274_p6 }
  0x2f   : > { %1762 = dma.hbm_to_vmem [thread:$0]  (!%p2251_p2), %s2826_s0, 2688, %s184_s9, [#allocation3], %s2805_s13, %s2805_s13, %s2806_s14  }
  0x30   : > { %s214_s9 = scalar_lea.vmem [#allocation7], %s1736_s25 }
  0x31   : > { %s2285_s27 = scalar_lea.hbm %s2828_s2, %s1783_s26  ;;  %s222_s28 = sshll.u32 %s214_s9, 4  ;;  %s2287_s28 = int_to_ptr.vmem [resolvable:$true] %s222_s28 }
  0x32   : > { %s1956_s13 = scalar_lea.hbm %s2285_s27, 9216  ;;  %s1961_s25 = scalar_lea.hbm %s2828_s2, 55296 }
  0x33   : > { %p1957_p5 = scmp.ne.s32.totalorder %s2285_s27, %s1956_s13  ;;  %p1962_p0 = scmp.lt.s32.totalorder %s2285_s27, %s2828_s2 }
  0x34   : > { %p1963_p7 = scmp.lt.s32.totalorder %s1961_s25, %s1956_s13 }
  0x35   : > { %p1959_p12 = pnand %p2296_p11, %p1957_p5 }
  0x36   : > { %p1964_p8 = por %p1963_p7, %p1962_p0 }
  0x37   : > { %p1960_p1 = pneg %p1959_p12 }
  0x39   : > { %p1965_p9 = pnand %p1964_p8, %p1960_p1 }
  0x3b   : > { %1968 = shalt.err (!%p1965_p9)
}
  0x3c   : > { %s1969_s11 = scalar_lea.vmem %s2287_s28, 9216  ;;  %s2143_s15 = smov [#allocation7]  }
  0x3d   : > { %p1970_p10 = scmp.ne.s32.totalorder %s2287_s28, %s1969_s11  ;;  %s1974_s26 = sshll.u32 %s2143_s15, 4  ;;  %s1975_s26 = int_to_ptr.vmem [resolvable:$false] %s1974_s26 }
  0x3e   : > { %s1976_s8 = scalar_lea.vmem %s1975_s26, 18432  ;;  %p1977_p4 = scmp.lt.s32.totalorder %s2287_s28, %s1975_s26 }
  0x3f   : > { %p1972_p5 = pnand %p1970_p10, %p2296_p11  ;;  %p1978_p3 = scmp.lt.s32.totalorder %s1976_s8, %s1969_s11 }
  0x41   : > { %p1973_p12 = pneg %p1972_p5  ;;  %p1979_p13 = por %p1978_p3, %p1977_p4 }
  0x43   : > { %p1980_p2 = pnand %p1979_p13, %p1973_p12 }
  0x45   : > { %1983 = shalt.err (!%p1980_p2)
}
  0x46   : > { %s2144_s13 = smov 192   ;;  %s2145_s25 = smov 12  }
  0x47   : > { %1769 = dma.hbm_to_vmem [thread:$0]  (!%p2274_p6), %s2285_s27, 9216, %s2287_s28, %s2290_s16, %s2144_s13, %s2144_s13, %s2145_s25  }
  0x48   : > { %s2321_s15 = smul.u32 3, %s212_s23  ;;  %s2146_s27 = smov [#allocation5]  }
  0x49   : > { %s2830_s12 = smul.u32 48, %s2138_s21  ;;  %s196_s28 = sshll.u32 %s2146_s27, 4  ;;  %s2338_s28 = int_to_ptr.vmem [resolvable:$true] %s196_s28 }
  0x4a   : > { %s236_s23 = scalar_lea.vmem [#allocation8], %s2321_s15  ;;  %s1989_s0 = scalar_lea.hbm %s2800_s3, 288 }
  0x4b   : > { %s2328_s26 = scalar_lea.hbm %s2800_s3, %s2830_s12  ;;  %s2831_s8 = smov %s2830_s12 }
  0x4c   : > { %s2335_s24 = scalar_lea.hbm %s2801_s4, %s2831_s8  ;;  %s244_s13 = sshll.u32 %s236_s23, 4  ;;  %s245_s13 = int_to_ptr.vmem [resolvable:$true] %s244_s13 }
  0x4d   : > { %s1984_s25 = scalar_lea.hbm %s2328_s26, 48  ;;  %p1990_p3 = scmp.lt.s32.totalorder %s2328_s26, %s2800_s3 }
  0x4e   : > { %p1985_p4 = scmp.ne.s32.totalorder %s2328_s26, %s1984_s25  ;;  %p1991_p1 = scmp.lt.s32.totalorder %s1989_s0, %s1984_s25 }
  0x50   : > { %p1987_p13 = pnand %p1985_p4, %p2296_p11  ;;  %p1992_p0 = por %p1991_p1, %p1990_p3 }
  0x52   : > { %p1988_p2 = pneg %p1987_p13 }
  0x54   : > { %p1993_p7 = pnand %p1992_p0, %p1988_p2 }
  0x56   : > { %1996 = shalt.err (!%p1993_p7)
}
  0x57   : > { %s1997_s8 = scalar_lea.vmem %s245_s13, 48  ;;  %s2147_s27 = smov [#allocation8]  }
  0x58   : > { %p1998_p8 = scmp.ne.s32.totalorder %s245_s13, %s1997_s8  ;;  %s2002_s23 = sshll.u32 %s2147_s27, 4  ;;  %s2003_s23 = int_to_ptr.vmem [resolvable:$false] %s2002_s23 }
  0x59   : > { %s2004_s20 = scalar_lea.vmem %s2003_s23, 96  ;;  %p2005_p5 = scmp.lt.s32.totalorder %s245_s13, %s2003_s23 }
  0x5a   : > { %p2000_p9 = pnand %p1998_p8, %p2296_p11  ;;  %p2006_p12 = scmp.lt.s32.totalorder %s2004_s20, %s1997_s8 }
  0x5c   : > { %p2001_p10 = pneg %p2000_p9  ;;  %p2007_p4 = por %p2006_p12, %p2005_p5 }
  0x5e   : > { %p2008_p13 = pnand %p2007_p4, %p2001_p10 }
  0x60   : > { %2011 = shalt.err (!%p2008_p13)
}
  0x61   : > { %1772 = dma.hbm_to_vmem [thread:$0]  (!%p2274_p6), %s2328_s26, 48, %s245_s13, %s2290_s16  }
  0x62   : > { %s2023_s25 = scalar_lea.vmem %s2338_s28, 2688  ;;  %p2832_p3 = scmp.ne.s32.totalorder %s2825_s10, 0 }
  0x63   : > { %p2024_p2 = scmp.ne.s32.totalorder %s2338_s28, %s2023_s25  ;;  %p2031_p8 = scmp.lt.s32.totalorder %s2338_s28, %s2338_s28 }
  0x64   : > { %p2833_p1 = pneg %p2832_p3  ;;  %p2032_p9 = scmp.lt.s32.totalorder %s2023_s25, %s2023_s25 }
  0x66   : > { %p2026_p0 = pnand %p2024_p2, %p2833_p1  ;;  %p2033_p10 = por %p2032_p9, %p2031_p8 }
  0x68   : > { %p2027_p7 = pneg %p2026_p0 }
  0x6a   : > { %p2034_p5 = pnand %p2033_p10, %p2027_p7 }
  0x6c   : > { %2037 = shalt.err (!%p2034_p5)
}
  0x6d   : > { %s2834_s20 = smov 24   ;;  %s2835_s12 = smov 384  }
  0x6e   : > { %1765 = dma.hbm_to_vmem [thread:$0]  (!%p2832_p3), %s2798_s1, 2688, %s2338_s28, [#allocation6], %s2835_s12, %s2835_s12, %s2834_s20  }
  0x6f   : > { %s255_s13 = scalar_lea.vmem [#allocation9], %s2321_s15  ;;  %s2038_s2 = scalar_lea.hbm %s2335_s24, 48 }
  0x70   : > { %s263_s0 = sshll.u32 %s255_s13, 4  ;;  %p2039_p12 = scmp.ne.s32.totalorder %s2335_s24, %s2038_s2  ;;  %s264_s0 = int_to_ptr.vmem [resolvable:$true] %s263_s0 }
  0x71   : > { %s2043_s8 = scalar_lea.hbm %s2801_s4, 288  ;;  %p2044_p2 = scmp.lt.s32.totalorder %s2335_s24, %s2801_s4 }
  0x72   : > { %p2041_p4 = pnand %p2039_p12, %p2296_p11  ;;  %p2045_p1 = scmp.lt.s32.totalorder %s2043_s8, %s2038_s2 }
  0x74   : > { %p2042_p13 = pneg %p2041_p4  ;;  %p2046_p0 = por %p2045_p1, %p2044_p2 }
  0x76   : > { %p2047_p7 = pnand %p2046_p0, %p2042_p13 }
  0x78   : > { %2050 = shalt.err (!%p2047_p7)
}
  0x79   : > { %s2051_s15 = scalar_lea.vmem %s264_s0, 48  ;;  %s2148_s28 = smov [#allocation9]  }
  0x7a   : > { %p2052_p3 = scmp.ne.s32.totalorder %s264_s0, %s2051_s15  ;;  %s2056_s25 = sshll.u32 %s2148_s28, 4  ;;  %s2057_s25 = int_to_ptr.vmem [resolvable:$false] %s2056_s25 }
  0x7b   : > { %s2058_s20 = scalar_lea.vmem %s2057_s25, 96  ;;  %p2059_p10 = scmp.lt.s32.totalorder %s264_s0, %s2057_s25 }
  0x7c   : > { %p2054_p8 = pnand %p2052_p3, %p2296_p11  ;;  %p2060_p5 = scmp.lt.s32.totalorder %s2058_s20, %s2051_s15 }
  0x7e   : > { %p2055_p9 = pneg %p2054_p8  ;;  %p2061_p12 = por %p2060_p5, %p2059_p10 }
  0x80   : > { %p2062_p4 = pnand %p2061_p12, %p2055_p9 }
  0x82   : > { %2065 = shalt.err (!%p2062_p4)
}
  0x83   : > { %1775 = dma.hbm_to_vmem [thread:$0]  (!%p2274_p6), %s2335_s24, 48, %s264_s0, %s2290_s16  }
  0x84   : > { %p2836_p13 = scmp.ne.s32.totalorder %s2824_s7, 0 }
  0x85   : > { %p2837_p11 = scmp.eq.s32.totalorder (!%p2836_p13), %s2204_s22, 0 }
  0x86   : > { %272 = sbr.rel (%p2836_p13) target bundleno = 624 (0x270), region = 40 }
  0x8b   : > { %2109 = dma.done.wait (%p2837_p11), [#allocation3], 2688   ;;  %p2838_p2 = pmov %p2837_p11 }
  0x8d   : > { %2111 = vsyncadd (%p2838_p2), [#allocation3], 4294964608  ;;  %p2839_p1 = pmov %p2838_p2 }
  0x8f   : > { %2113 = dma.done.wait (%p2839_p1), [#allocation6], 2688   ;;  %p2840_p0 = pmov %p2839_p1 }
  0x90   : > { %s282_s14 = sand.u32 1, %s2204_s22   ;;  %s2403_s24 = sand.u32 1, %s2130_s19  }
  0x91   : > { %2115 = vsyncadd (%p2840_p0), [#allocation6], 4294964608  ;;  %s1740_s7 = smul.u32 576, %s2403_s24  ;;  %s283_s17 = scalar_lea.sflag [#allocation3], %s282_s14 }
  0x92   : > { %p2841_p6 = scmp.ne.s32.totalorder %s2821_s29, 0 }
  0x93   : > { %s2406_s16 = scalar_lea.vmem [#allocation7], %s1740_s7 }
  0x94   : > { %2117 = dma.done.wait (%p2841_p6), %s283_s17, 9312  }
  0x95   : > { %2119 = vsyncadd (%p2841_p6), %s283_s17, 4294957984  ;;  %v1828_v0 = vld [vmem:[%s2406_s16 + $0xac] ss:$12 sps:$4 sm:$0xff]   ;;  %v1830_v1 = vld [vmem:[%s2406_s16 + $0x170] ss:$12 sps:$4 sm:$0xff]   ;;  %vm1176_vm0 = vcmask 1040384  }
  0x96   : > { %901 = vmatprep.subr.bf16.mxu0 %v1828_v0  ;;  %v1831_v2 = vld [vmem:[%s2406_s16 + $0xa8] ss:$12 sps:$4 sm:$0xff]   ;;  %1660 = vmatprep.subr.bf16.mxu1 %v1830_v1  ;;  %v1832_v3 = vld [vmem:[%s2406_s16 + $0xb0] ss:$12 sps:$4 sm:$0xff]   ;;  %v1835_v5 = vld [vmem:[%s2406_s16 + $0x158] ss:$12 sps:$4 sm:$0xff]  }
  0x97   : > { %902 = vmatpush1.bf16.xpose.msra.mxu0 %v1831_v2  ;;  %v1833_v4 = vld [vmem:[%s2406_s16 + $0x94] ss:$12 sps:$4 sm:$0xff]   ;;  %1661 = vmatpush3.bf16.xpose.msra.mxu1 %v1832_v3  ;;  %v1836_v6 = vld [vmem:[%s2406_s16 + $0x90] ss:$12 sps:$4 sm:$0xff]   ;;  %v1837_v7 = vld [vmem:[%s2406_s16 + $0x98] ss:$12 sps:$4 sm:$0xff]  }
  0x98   : > { %903 = vmatprep.subr.bf16.mxu0 %v1833_v4  ;;  %1662 = vmatprep.subr.bf16.mxu1 %v1835_v5  ;;  %v1838_v8 = vld [vmem:[%s2406_s16 + $0x7c] ss:$12 sps:$4 sm:$0xff]   ;;  %v1840_v9 = vld [vmem:[%s2406_s16 + $0x140] ss:$12 sps:$4 sm:$0xff]   ;;  %v1841_v10 = vld [vmem:[%s2406_s16 + $0x78] ss:$12 sps:$4 sm:$0xff]  }
  0x99   : > { %v1842_v11 = vld [vmem:[%s2406_s16 + $0x80] ss:$12 sps:$4 sm:$0xff]   ;;  %v1843_v12 = vld [vmem:[%s2406_s16 + $0x64] ss:$12 sps:$4 sm:$0xff]   ;;  %v1845_v13 = vld [vmem:[%s2406_s16 + $0x128] ss:$12 sps:$4 sm:$0xff]  }
  0x9a   : > { %v1846_v14 = vld [vmem:[%s2406_s16 + $0x60] ss:$12 sps:$4 sm:$0xff]   ;;  %v1847_v15 = vld [vmem:[%s2406_s16 + $0x68] ss:$12 sps:$4 sm:$0xff]   ;;  %v1850_v17 = vld [vmem:[%s2406_s16 + $0x110] ss:$12 sps:$4 sm:$0xff]  }
  0x9b   : > { %v1848_v16 = vld [vmem:[%s2406_s16 + $0x4c] ss:$12 sps:$4 sm:$0xff]   ;;  %v348_v18 = vld [vmem:[#allocation2 + $0x10] sm:$0xff]  ;;  %v1851_v25 = vld [vmem:[%s2406_s16 + $0x48] ss:$12 sps:$4 sm:$0xff]   ;;  %s1741_s29 = smul.u32 3, %s2403_s24 }
  0x9c   : > { %v351_v19 = vld [vmem:[#allocation2 + $0x28] sm:$0xff]  ;;  %v369_v20 = vld [vmem:[#allocation5 + $0x10] sm:$0xff]  ;;  %v372_v21 = vld [vmem:[#allocation5 + $0x28] sm:$0xff]  ;;  %s1742_s26 = smul.u32 168, %s2403_s24  ;;  %s1426_s8 = scalar_lea.sflag [#allocation4], %s2403_s24 }
  0x9d   : > { %v390_v22 = vadd.f32 %v369_v20, %v348_v18  ;;  %v393_v23 = vadd.f32 %v372_v21, %v351_v19  ;;  %v1852_v26 = vld [vmem:[%s2406_s16 + $0x50] ss:$12 sps:$4 sm:$0xff]   ;;  %v1853_v27 = vld [vmem:[%s2406_s16 + $0x34] ss:$12 sps:$4 sm:$0xff]   ;;  %v1855_v28 = vld [vmem:[%s2406_s16 + $0xf8] ss:$12 sps:$4 sm:$0xff]  }
  0x9e   : > { %v1856_v29 = vld [vmem:[%s2406_s16 + $0x30] ss:$12 sps:$4 sm:$0xff]   ;;  %v1857_v30 = vld [vmem:[%s2406_s16 + $0x38] ss:$12 sps:$4 sm:$0xff]   ;;  %v1860_v32 = vld [vmem:[%s2406_s16 + $0xe0] ss:$12 sps:$4 sm:$0xff]  }
  0x9f   : > { %904 = vmatpush1.bf16.xpose.msra.mxu0 %v1836_v6  ;;  %1663 = vmatpush3.bf16.xpose.msra.mxu1 %v1837_v7  ;;  %v2430_v24 = vpack.c.bf16 %v393_v23, %v390_v22  ;;  %v1858_v31 = vld [vmem:[%s2406_s16 + $0x1c] ss:$12 sps:$4 sm:$0xff]   ;;  %v1861_v33 = vld [vmem:[%s2406_s16 + $0x18] ss:$12 sps:$4 sm:$0xff]   ;;  %v1862_v34 = vld [vmem:[%s2406_s16 + $0x20] ss:$12 sps:$4 sm:$0xff]  }
  0xa0   : > { %905 = vmatprep.subr.bf16.mxu0 %v1838_v8  ;;  %1664 = vmatprep.subr.bf16.mxu1 %v1840_v9  ;;  %v1863_v35 = vld [vmem:[%s2406_s16 + $0x4] ss:$12 sps:$4 sm:$0xff]   ;;  %v1865_v36 = vld [vmem:[%s2406_s16 + $0xc8] ss:$12 sps:$4 sm:$0xff]   ;;  %v347_v37 = vld [vmem:[#allocation2 + $0x8] sm:$0xff]  ;;  %s295_s12 = scalar_lea.vmem [#allocation8], %s1741_s29 }
  0xa1   : > { %1676 = vmatprep.mubr.bf16.mxu1 %v2430_v24  ;;  %v350_v38 = vld [vmem:[#allocation2 + $0x20] sm:$0xff]  ;;  %v368_v39 = vld [vmem:[#allocation5 + $0x8] sm:$0xff]  ;;  %v371_v40 = vld [vmem:[#allocation5 + $0x20] sm:$0xff]  ;;  %s304_s9 = scalar_lea.vmem [#allocation9], %s1741_s29  ;;  %s2665_s13 = scalar_lea.vmem [#allocation10], %s1742_s26 }
  0xa2   : > { %v389_v41 = vadd.f32 %v368_v39, %v347_v37  ;;  %v392_v42 = vadd.f32 %v371_v40, %v350_v38  ;;  %v1866_v43 = vld [vmem:[%s2406_s16] ss:$12 sps:$4 sm:$0xff]   ;;  %v1867_v45 = vld [vmem:[%s2406_s16 + $0x8] ss:$12 sps:$4 sm:$0xff]   ;;  %v375_v50 = vld [vmem:[#allocation5 + $0x40] sm:$0xff]  ;;  %s1659_s0 = smul.u32 384, %s2204_s22 }
  0xa3   : > { %v1868_v46 = vld [vmem:[%s2406_s16 + $0x16c] ss:$12 sps:$4 sm:$0xff]   ;;  %v354_v48 = vld [vmem:[#allocation2 + $0x40] sm:$0xff]  ;;  %v360_v58 = vld [vmem:[#allocation2 + $0x70] sm:$0xff]  ;;  %s1439_s2 = sshll.u32 %s2665_s13, 4  ;;  %p2842_p3 = scmp.ne.s32.totalorder %s2822_s30, 0  ;;  %s2748_s2 = int_to_ptr.vmem [resolvable:$true] %s1439_s2 }
  0xa4   : > { %v2446_v44 = vpack.c.bf16 %v392_v42, %v389_v41  ;;  %v1872_v47 = vld [vmem:[%s2406_s16 + $0x22c] ss:$12 sps:$4 sm:$0xff]   ;;  %v378_v51 = vld [vmem:[#allocation5 + $0x58] sm:$0xff]  ;;  %v396_v52 = vadd.f32 %v375_v50, %v354_v48  ;;  %v384_v62 = vld [vmem:[#allocation5 + $0x88] sm:$0xff]  ;;  %s2746_s11 = scalar_lea.hbm %s2802_s5, %s1659_s0  ;;  %s2066_s27 = scalar_lea.vmem %s2748_s2, 2688 }
  0xa5   : > { %v357_v49 = vld [vmem:[#allocation2 + $0x58] sm:$0xff]  ;;  %v1874_v56 = vld [vmem:[%s2406_s16 + $0x154] ss:$12 sps:$4 sm:$0xff]   ;;  %v363_v59 = vld [vmem:[#allocation2 + $0x88] sm:$0xff]  ;;  %p2067_p7 = scmp.ne.s32.totalorder %s2748_s2, %s2066_s27  ;;  %s2149_s23 = smov [#allocation10]  }
  0xa6   : > { %933 = vmatprep.mubr.bf16.mxu0 %v2446_v44  ;;  %v399_v53 = vadd.f32 %v378_v51, %v357_v49  ;;  %v1870_v54 = vld [vmem:[%s2406_s16 + $0x228] ss:$12 sps:$4 sm:$0xff]   ;;  %v405_v0 = vadd.f32 %v384_v62, %v363_v59  ;;  %v1879_v1 = vld [vmem:[%s2406_s16 + $0x150] ss:$12 sps:$4 sm:$0xff]   ;;  %v387_v7 = vld [vmem:[#allocation5 + $0xa0] sm:$0x1] }
  0xa7   : > { %906 = vmatpush1.bf16.xpose.msra.mxu0 %v1841_v10  ;;  %1665 = vmatpush3.bf16.xpose.msra.mxu1 %v1842_v11  ;;  %v1873_v55 = vld [vmem:[%s2406_s16 + $0x168] ss:$12 sps:$4 sm:$0xff]   ;;  %v1876_v2 = vld [vmem:[%s2406_s16 + $0x210] ss:$12 sps:$4 sm:$0xff]   ;;  %v1885_v9 = vld [vmem:[%s2406_s16 + $0x138] ss:$12 sps:$4 sm:$0xff]   ;;  %p2068_p8 = pnand %p2067_p7, %p2842_p3 }
  0xa8   : > { %907 = vmatprep.subr.bf16.mxu0 %v1843_v12  ;;  %1666 = vmatprep.subr.bf16.mxu1 %v1845_v13  ;;  %v1878_v57 = vld [vmem:[%s2406_s16 + $0x214] ss:$12 sps:$4 sm:$0xff]   ;;  %v2456_v60 = vpack.c.bf16 %v399_v53, %v396_v52  ;;  %v381_v61 = vld [vmem:[#allocation5 + $0x70] sm:$0xff]  ;;  %v366_v6 = vld [vmem:[#allocation2 + $0xa0] sm:$0x1]  ;;  %s2070_s15 = sshll.u32 %s2149_s23, 4  ;;  %s2071_s15 = int_to_ptr.vmem [resolvable:$false] %s2070_s15 }
  0xa9   : > { %v402_v63 = vadd.f32 %v381_v61, %v360_v58  ;;  %v1880_v3 = vld [vmem:[%s2406_s16 + $0x13c] ss:$12 sps:$4 sm:$0xff]   ;;  %v408_v8 = vadd.f32 %v387_v7, %v366_v6  ;;  %v1882_v10 = vld [vmem:[%s2406_s16 + $0x1f8] ss:$12 sps:$4 sm:$0xff]   ;;  %v1898_v20 = vld [vmem:[%s2406_s16 + $0xf4] ss:$12 sps:$4 sm:$0xff]   ;;  %p2069_p9 = pneg %p2068_p8  ;;  %p2073_p10 = scmp.lt.s32.totalorder %s2748_s2, %s2071_s15 }
  0xaa   : > { %v1884_v4 = vld [vmem:[%s2406_s16 + $0x1fc] ss:$12 sps:$4 sm:$0xff]   ;;  %v1886_v11 = vld [vmem:[%s2406_s16 + $0x124] ss:$12 sps:$4 sm:$0xff]   ;;  %v1902_v21 = vld [vmem:[%s2406_s16 + $0x1b4] ss:$12 sps:$4 sm:$0xff]  }
  0xab   : > { %v2464_v5 = vpack.c.bf16 %v405_v0, %v402_v63  ;;  %v1890_v12 = vld [vmem:[%s2406_s16 + $0x1e4] ss:$12 sps:$4 sm:$0xff]   ;;  %v2472_v13 = vpack.c.bf16 %v408_v8, %v408_v8  ;;  %v1897_v18 = vld [vmem:[%s2406_s16 + $0x108] ss:$12 sps:$4 sm:$0xff]   ;;  %v355_v48 = vld [vmem:[#allocation2 + $0x48] sm:$0xff]  ;;  %s2072_s28 = scalar_lea.vmem %s2071_s15, 5376 }
  0xac   : > { %v1894_v19 = vld [vmem:[%s2406_s16 + $0x1c8] ss:$12 sps:$4 sm:$0xff]   ;;  %v1903_v22 = vld [vmem:[%s2406_s16 + $0xf0] ss:$12 sps:$4 sm:$0xff]   ;;  %v356_v39 = vld [vmem:[#allocation2 + $0x50] sm:$0xff]  ;;  %p2074_p5 = scmp.lt.s32.totalorder %s2072_s28, %s2066_s27 }
  0xad   : > { %v1900_v23 = vld [vmem:[%s2406_s16 + $0x1b0] ss:$12 sps:$4 sm:$0xff]   ;;  %v353_v38 = vld [vmem:[#allocation2 + $0x38] sm:$0xff]  ;;  %v376_v50 = vld [vmem:[#allocation5 + $0x48] sm:$0xff] }
  0xae   : > { %v1916_v37 = vld [vmem:[%s2406_s16 + $0x230] ss:$12 sps:$4 sm:$0xff]   ;;  %v377_v41 = vld [vmem:[#allocation5 + $0x50] sm:$0xff]  ;;  %v397_v58 = vadd.f32 %v376_v50, %v355_v48  ;;  %p2075_p12 = por %p2074_p5, %p2073_p10 }
  0xaf   : > { %908 = vmatpush1.bf16.xpose.msra.mxu0 %v1846_v14  ;;  %1667 = vmatpush3.bf16.xpose.msra.mxu1 %v1847_v15  ;;  %v1891_v14 = vld [vmem:[%s2406_s16 + $0x120] ss:$12 sps:$4 sm:$0xff]   ;;  %v374_v40 = vld [vmem:[#allocation5 + $0x38] sm:$0xff]  ;;  %v359_v51 = vld [vmem:[#allocation2 + $0x68] sm:$0xff] }
  0xb0   : > { %909 = vmatprep.subr.bf16.mxu0 %v1848_v16  ;;  %1668 = vmatprep.subr.bf16.mxu1 %v1850_v17  ;;  %v1888_v15 = vld [vmem:[%s2406_s16 + $0x1e0] ss:$12 sps:$4 sm:$0xff]   ;;  %v362_v53 = vld [vmem:[#allocation2 + $0x80] sm:$0xff]  ;;  %v365_v6 = vld [vmem:[#allocation2 + $0x98] sm:$0x1]  ;;  %p2076_p4 = pnand %p2075_p12, %p2069_p9 }
  0xb1   : > { %v1892_v16 = vld [vmem:[%s2406_s16 + $0x10c] ss:$12 sps:$4 sm:$0xff]   ;;  %v358_v63 = vld [vmem:[#allocation2 + $0x60] sm:$0xff] }
  0xb2   : > { %v1896_v17 = vld [vmem:[%s2406_s16 + $0x1cc] ss:$12 sps:$4 sm:$0xff]   ;;  %v386_v7 = vld [vmem:[#allocation5 + $0x98] sm:$0x1] }
  0xb3   : > { %v373_v49 = vld [vmem:[#allocation5 + $0x30] sm:$0xff] }
  0xb7   : > { %910 = vmatpush1.bf16.xpose.msra.mxu0 %v1851_v25  ;;  %1669 = vmatpush3.bf16.xpose.msra.mxu1 %v1852_v26  ;;  %v1904_v25 = vld [vmem:[%s2406_s16 + $0xdc] ss:$12 sps:$4 sm:$0xff]  }
  0xb8   : > { %911 = vmatprep.subr.bf16.mxu0 %v1853_v27  ;;  %1670 = vmatprep.subr.bf16.mxu1 %v1855_v28  ;;  %v1908_v26 = vld [vmem:[%s2406_s16 + $0x19c] ss:$12 sps:$4 sm:$0xff]   ;;  %v1909_v27 = vld [vmem:[%s2406_s16 + $0xd8] ss:$12 sps:$4 sm:$0xff]  }
  0xb9   : > { %v1906_v28 = vld [vmem:[%s2406_s16 + $0x198] ss:$12 sps:$4 sm:$0xff]  }
  0xbf   : > { %912 = vmatpush1.bf16.xpose.msra.mxu0 %v1856_v29  ;;  %1671 = vmatpush3.bf16.xpose.msra.mxu1 %v1857_v30  ;;  %v1910_v29 = vld [vmem:[%s2406_s16 + $0xc4] ss:$12 sps:$4 sm:$0xff]  }
  0xc0   : > { %913 = vmatprep.subr.bf16.mxu0 %v1858_v31  ;;  %1672 = vmatprep.subr.bf16.mxu1 %v1860_v32  ;;  %v1914_v30 = vld [vmem:[%s2406_s16 + $0x184] ss:$12 sps:$4 sm:$0xff]   ;;  %v1915_v31 = vld [vmem:[%s2406_s16 + $0xc0] ss:$12 sps:$4 sm:$0xff]  }
  0xc1   : > { %v346_v32 = vld [vmem:[#allocation2] sm:$0xff] }
  0xc7   : > { %914 = vmatpush1.bf16.xpose.msra.mxu0 %v1861_v33  ;;  %1673 = vmatpush3.bf16.xpose.msra.mxu1 %v1862_v34  ;;  %v349_v33 = vld [vmem:[#allocation2 + $0x18] sm:$0xff]  ;;  %v367_v34 = vld [vmem:[#allocation5] sm:$0xff] }
  0xc8   : > { %915 = vmatprep.subr.bf16.mxu0 %v1863_v35  ;;  %1674 = vmatprep.subr.bf16.mxu1 %v1865_v36  ;;  %v370_v35 = vld [vmem:[#allocation5 + $0x18] sm:$0xff]  ;;  %v1912_v36 = vld [vmem:[%s2406_s16 + $0x180] ss:$12 sps:$4 sm:$0xff]   ;;  %v388_v42 = vadd.f32 %v367_v34, %v346_v32 }
  0xcf   : > { %916 = vmatpush1.bf16.xpose.msra.mxu0 %v1866_v43  ;;  %1675 = vmatpush3.bf16.xpose.msra.mxu1 %v1867_v45  ;;  %v391_v43 = vadd.f32 %v370_v35, %v349_v33  ;;  %v398_v45 = vadd.f32 %v377_v41, %v356_v39 }
  0xd0   : > { %917 = vmatprep.subr.bf16.mxu0 %v1868_v46  ;;  %1043 = vmatprep.subr.bf16.mxu1 %v1872_v47  ;;  %v352_v47 = vld [vmem:[#allocation2 + $0x30] sm:$0xff] }
  0xd1   : > { %v409_v46 = vpack.c.bf16 %v391_v43, %v388_v42 }
  0xd6   : > { %1677 = vmatmul.mubr.bf16.vlgmr.msra.gmra.mxu1 %v2430_v24 }
  0xd7   : > { %918 = vmatpush2.bf16.xpose.msra.mxu0 %v1873_v55  ;;  %1044 = vmatpush1.bf16.xpose.msra.mxu1 %v1870_v54  ;;  %v380_v54 = vld [vmem:[#allocation5 + $0x68] sm:$0xff]  ;;  %v383_v55 = vld [vmem:[#allocation5 + $0x80] sm:$0xff] }
  0xd8   : > { %919 = vmatprep.subr.bf16.mxu0 %v1874_v56  ;;  %1045 = vmatprep.subr.bf16.mxu1 %v1878_v57  ;;  %v1917_v56 = vld [vmem:[%s2406_s16 + $0x218] ss:$12 sps:$4 sm:$0xff]   ;;  %v394_v57 = vadd.f32 %v373_v49, %v352_v47  ;;  %v401_v59 = vadd.f32 %v380_v54, %v359_v51  ;;  %v404_v61 = vadd.f32 %v383_v55, %v362_v53 }
  0xd9   : > { %1678 = vmatprep.mubr.bf16.mxu1 %v2456_v60 }
  0xda   : > { %v412_v62 = vpack.c.bf16 %v397_v58, %v394_v57  ;;  %v416_v0 = vpack.c.bf16 %v404_v61, %v401_v59 }
  0xde   : > { %1679 = vmatmul.mubr.bf16.gmra.mxu1 %v2456_v60 }
  0xdf   : > { %920 = vmatpush2.bf16.xpose.msra.mxu0 %v1879_v1  ;;  %1046 = vmatpush1.bf16.xpose.msra.mxu1 %v1876_v2  ;;  %v361_v1 = vld [vmem:[#allocation2 + $0x78] sm:$0xff]  ;;  %v379_v2 = vld [vmem:[#allocation5 + $0x60] sm:$0xff] }
  0xe0   : > { %921 = vmatprep.subr.bf16.mxu0 %v1880_v3  ;;  %1047 = vmatprep.subr.bf16.mxu1 %v1884_v4  ;;  %v382_v3 = vld [vmem:[#allocation5 + $0x78] sm:$0xff]  ;;  %v1918_v4 = vld [vmem:[%s2406_s16 + $0x200] ss:$12 sps:$4 sm:$0xff]   ;;  %v400_v8 = vadd.f32 %v379_v2, %v358_v63 }
  0xe1   : > { %1680 = vmatprep.mubr.bf16.mxu1 %v2464_v5 }
  0xe6   : > { %1681 = vmatmul.mubr.bf16.gmra.mxu1 %v2464_v5 }
  0xe7   : > { %922 = vmatpush2.bf16.xpose.msra.mxu0 %v1885_v9  ;;  %1048 = vmatpush1.bf16.xpose.msra.mxu1 %v1882_v10  ;;  %v403_v9 = vadd.f32 %v382_v3, %v361_v1  ;;  %v407_v10 = vadd.f32 %v386_v7, %v365_v6 }
  0xe8   : > { %923 = vmatprep.subr.bf16.mxu0 %v1886_v11  ;;  %1049 = vmatprep.subr.bf16.mxu1 %v1890_v12 }
  0xe9   : > { %1682 = vmatprep.mubr.bf16.mxu1 %v2472_v13  ;;  %v415_v11 = vpack.c.bf16 %v403_v9, %v400_v8  ;;  %v419_v12 = vpack.c.bf16 %v407_v10, %v407_v10 }
  0xee   : > { %1683 = vmatmul.mubr.bf16.gmra.mxu1 %v2472_v13 }
  0xef   : > { %924 = vmatpush2.bf16.xpose.msra.mxu0 %v1891_v14  ;;  %1050 = vmatpush1.bf16.xpose.msra.mxu1 %v1888_v15  ;;  %v364_v14 = vld [vmem:[#allocation2 + $0x90] sm:$0x1]  ;;  %v385_v15 = vld [vmem:[#allocation5 + $0x90] sm:$0x1] }
  0xf0   : > { %925 = vmatprep.subr.bf16.mxu0 %v1892_v16  ;;  %1051 = vmatprep.subr.bf16.mxu1 %v1896_v17  ;;  %v1919_v16 = vld [vmem:[%s2406_s16 + $0x1e8] ss:$12 sps:$4 sm:$0xff]   ;;  %v406_v17 = vadd.f32 %v385_v15, %v364_v14 }
  0xf1   : > { %1075 = vmatprep.mubr.bf16.mxu1 %v2446_v44  ;;  %v395_v44 = vadd.f32 %v374_v40, %v353_v38 }
  0xf3   : > { %v413_v52 = vpack.c.bf16 %v398_v45, %v395_v44 }
  0xf7   : > { %926 = vmatpush2.bf16.xpose.msra.mxu0 %v1897_v18  ;;  %1052 = vmatpush1.bf16.xpose.msra.mxu1 %v1894_v19  ;;  %v418_v18 = vpack.c.bf16 %v406_v17, %v406_v17  ;;  %v1920_v19 = vld [vmem:[%s2406_s16 + $0x1d0] ss:$12 sps:$4 sm:$0xff]  }
  0xf8   : > { %927 = vmatprep.subr.bf16.mxu0 %v1898_v20  ;;  %1053 = vmatprep.subr.bf16.mxu1 %v1902_v21  ;;  %v1921_v20 = vld [vmem:[%s2406_s16 + $0x1b8] ss:$12 sps:$4 sm:$0xff]   ;;  %v1922_v21 = vld [vmem:[%s2406_s16 + $0x1a0] ss:$12 sps:$4 sm:$0xff]  }
  0xff   : > { %928 = vmatpush2.bf16.xpose.msra.mxu0 %v1903_v22  ;;  %1054 = vmatpush1.bf16.xpose.msra.mxu1 %v1900_v23  ;;  %v1923_v22 = vld [vmem:[%s2406_s16 + $0x188] ss:$12 sps:$4 sm:$0xff]  }
 0x100   : > { %929 = vmatprep.subr.bf16.mxu0 %v1904_v25  ;;  %1055 = vmatprep.subr.bf16.mxu1 %v1908_v26 }
 0x107   : > { %930 = vmatpush2.bf16.xpose.msra.mxu0 %v1909_v27  ;;  %1056 = vmatpush1.bf16.xpose.msra.mxu1 %v1906_v28 }
 0x108   : > { %931 = vmatprep.subr.bf16.mxu0 %v1910_v29  ;;  %1057 = vmatprep.subr.bf16.mxu1 %v1914_v30 }
 0x10f   : > { %932 = vmatpush2.bf16.xpose.msra.mxu0 %v1915_v31  ;;  %1058 = vmatpush1.bf16.xpose.msra.mxu1 %v1912_v36 }
 0x110   : > { %1696 = vmatprep.subr.bf16.mxu0 %v1916_v37  ;;  %1720 = vmatprep.subr.bf16.mxu1 %v1916_v37 }
 0x116   : > { %934 = vmatmul.mubr.bf16.vlgmr.msra.gmra.mxu0 %v409_v46  ;;  %1076 = vmatmul.mubr.bf16.vlgmr.msra.gmra.mxu1 %v409_v46 }
 0x117   : > { %1697 = vmatpush3.bf16.xpose.msra.mxu0 %v1916_v37  ;;  %1728 = vmatpush3.bf16.xpose.msra.mxu1 %v1916_v37 }
 0x118   : > { %943 = vmatprep.mubr.bf16.mxu0 %v413_v52  ;;  %1698 = vmatprep.subr.bf16.mxu0 %v1917_v56 }
 0x119   : > { %1721 = vmatprep.subr.bf16.mxu1 %v1917_v56  ;;  %1083 = vmatprep.mubr.bf16.mxu1 %v413_v52 }
 0x11e   : > { %944 = vmatmul.mubr.bf16.gmra.mxu0 %v412_v62  ;;  %1084 = vmatmul.mubr.bf16.gmra.mxu1 %v412_v62 }
 0x11f   : > { %1699 = vmatpush3.bf16.xpose.msra.mxu0 %v1917_v56  ;;  %953 = vmatprep.mubr.bf16.mxu0 %v416_v0 }
 0x120   : > { %1729 = vmatpush3.bf16.xpose.msra.mxu1 %v1917_v56  ;;  %1700 = vmatprep.subr.bf16.mxu0 %v1918_v4 }
 0x121   : > { %1722 = vmatprep.subr.bf16.mxu1 %v1918_v4  ;;  %1091 = vmatprep.mubr.bf16.mxu1 %v416_v0 }
 0x126   : > { %954 = vmatmul.mubr.bf16.gmra.mxu0 %v415_v11  ;;  %1092 = vmatmul.mubr.bf16.gmra.mxu1 %v415_v11 }
 0x127   : > { %1701 = vmatpush3.bf16.xpose.msra.mxu0 %v1918_v4  ;;  %963 = vmatprep.mubr.bf16.mxu0 %v419_v12 }
 0x128   : > { %1730 = vmatpush3.bf16.xpose.msra.mxu1 %v1918_v4  ;;  %1702 = vmatprep.subr.bf16.mxu0 %v1919_v16 }
 0x129   : > { %1723 = vmatprep.subr.bf16.mxu1 %v1919_v16  ;;  %1099 = vmatprep.mubr.bf16.mxu1 %v419_v12 }
 0x12e   : > { %964 = vmatmul.mubr.bf16.gmra.mxu0 %v418_v18  ;;  %1100 = vmatmul.mubr.bf16.gmra.mxu1 %v418_v18 }
 0x12f   : > { %1703 = vmatpush3.bf16.xpose.msra.mxu0 %v1919_v16  ;;  %1712 = vmatprep.mubr.bf16.mxu0 %v2430_v24 }
 0x130   : > { %1731 = vmatpush3.bf16.xpose.msra.mxu1 %v1919_v16  ;;  %1704 = vmatprep.subr.bf16.mxu0 %v1920_v19 }
 0x131   : > { %1724 = vmatprep.subr.bf16.mxu1 %v1920_v19  ;;  %1716 = vmatprep.mubr.bf16.mxu1 %v2464_v5 }
 0x137   : > { %1705 = vmatpush3.bf16.xpose.msra.mxu0 %v1920_v19 }
 0x138   : > { %1732 = vmatpush3.bf16.xpose.msra.mxu1 %v1920_v19  ;;  %1706 = vmatprep.subr.bf16.mxu0 %v1921_v20 }
 0x139   : > { %1725 = vmatprep.subr.bf16.mxu1 %v1921_v20 }
 0x13f   : > { %1707 = vmatpush3.bf16.xpose.msra.mxu0 %v1921_v20 }
 0x140   : > { %1733 = vmatpush3.bf16.xpose.msra.mxu1 %v1921_v20  ;;  %1708 = vmatprep.subr.bf16.mxu0 %v1922_v21 }
 0x141   : > { %1726 = vmatprep.subr.bf16.mxu1 %v1922_v21 }
 0x147   : > { %1709 = vmatpush3.bf16.xpose.msra.mxu0 %v1922_v21 }
 0x148   : > { %1734 = vmatpush3.bf16.xpose.msra.mxu1 %v1922_v21  ;;  %1710 = vmatprep.subr.bf16.mxu0 %v1923_v22 }
 0x149   : > { %1727 = vmatprep.subr.bf16.mxu1 %v1923_v22 }
 0x14f   : > { %1711 = vmatpush3.bf16.xpose.msra.mxu0 %v1923_v22 }
 0x150   : > { %1735 = vmatpush3.bf16.xpose.msra.mxu1 %v1923_v22 }
 0x156   : > { %1713 = vmatmul.mubr.bf16.vlgmr.msra.gmra.mxu0 %v2456_v60 }
 0x157   : > { %1717 = vmatmul.mubr.bf16.vlgmr.msra.gmra.mxu1 %v2472_v13 }
 0x196   : > { %v1006_v24 = vpop.f32.mrf.mxu1 }
 0x198   : > { %v1008_v5 = vpop.f32.mrf.mxu1 }
 0x19a   : > { %v1010_v23 = vpop.f32.mrf.mxu1 }
 0x19c   : > { %v1012_v25 = vpop.f32.mrf.mxu1 }
 0x19e   : > { %v1016_v26 = vpop.f32.mrf.mxu1 }
 0x1a0   : > { %v1018_v27 = vpop.f32.mrf.mxu1 }
 0x1a2   : > { %v1020_v28 = vpop.f32.mrf.mxu1 }
 0x1a4   : > { %v1022_v29 = vpop.f32.mrf.mxu1 }
 0x1a6   : > { %v1026_v30 = vpop.f32.mrf.mxu1 }
 0x1a8   : > { %v1028_v31 = vpop.f32.mrf.mxu1 }
 0x1aa   : > { %v1030_v32 = vpop.f32.mrf.mxu1 }
 0x1ac   : > { %v2508_v33 = vpop.f32.mrf.mxu1 }
 0x1ae   : > { %v2510_v34 = vpop.f32.mrf.mxu1 }
 0x1b0   : > { %v2512_v35 = vpop.f32.mrf.mxu1 }
 0x1b2   : > { %v1040_v60 = vpop.f32.mrf.mxu1 }
 0x1b4   : > { %v1041_v36 = vpop.f32.mrf.mxu1 }
 0x1d6   : > { %v935_v13 = vpop.f32.mrf.mxu0  ;;  %v2514_v37 = vpop.f32.mrf.mxu1 }
 0x1d7   : > { %v2516_v39 = vadd.f32 %v1006_v24, %v935_v13 }
 0x1d8   : > { %v937_v38 = vpop.f32.mrf.mxu0  ;;  %v1079_v40 = vpop.f32.mrf.mxu1 }
 0x1d9   : > { %v2518_v41 = vadd.f32 %v1008_v5, %v937_v38  ;;  %v1214_v46 = vmul.f32 %v2516_v39, %v2516_v39 }
 0x1da   : > { %v939_v42 = vpop.f32.mrf.mxu0  ;;  %v2522_v44 = vpop.f32.mrf.mxu1 }
 0x1db   : > { %v2520_v43 = vadd.f32 %v1010_v23, %v939_v42  ;;  %v1215_v51 = vmul.f32 %v2518_v41, %v2518_v41 }
 0x1dc   : > { %v941_v45 = vpop.f32.mrf.mxu0  ;;  %v1082_v50 = vpop.f32.mrf.mxu1 }
 0x1dd   : > { %v1171_v47 = vadd.f32 %v2520_v43, %v2516_v39  ;;  %v1217_v48 = vmul.f32 %v2520_v43, %v2520_v43  ;;  %v2530_v49 = vadd.f32 %v1012_v25, %v941_v45 }
 0x1de   : > { %v945_v52 = vpop.f32.mrf.mxu0  ;;  %v2545_v63 = vpop.f32.mrf.mxu1 }
 0x1df   : > { %v1235_v53 = vadd.f32 %v1217_v48, %v1214_v46  ;;  %v1185_v54 = vadd.f32 %v2530_v49, %v2518_v41  ;;  %v1218_v55 = vmul.f32 %v2530_v49, %v2530_v49  ;;  %v2538_v56 = vadd.f32 %v1016_v26, %v945_v52 }
 0x1e0   : > { %v947_v57 = vpop.f32.mrf.mxu0  ;;  %v1087_v6 = vpop.f32.mrf.mxu1 }
 0x1e1   : > { %v1248_v58 = vadd.f32 %v1218_v55, %v1215_v51  ;;  %v1172_v59 = vadd.f32 %v1171_v47, %v2538_v56  ;;  %v1220_v61 = vmul.f32 %v2538_v56, %v2538_v56  ;;  %v2543_v62 = vadd.f32 %v1018_v27, %v947_v57 }
 0x1e2   : > { %v949_v0 = vpop.f32.mrf.mxu0  ;;  %v2557_v12 = vpop.f32.mrf.mxu1 }
 0x1e3   : > { %v1236_v1 = vadd.f32 %v1235_v53, %v1220_v61  ;;  %v1186_v2 = vadd.f32 %v1185_v54, %v2543_v62  ;;  %v1221_v3 = vmul.f32 %v2543_v62, %v2543_v62  ;;  %v2550_v4 = vadd.f32 %v1020_v28, %v949_v0 }
 0x1e4   : > { %v951_v7 = vpop.f32.mrf.mxu0  ;;  %v1090_v19 = vpop.f32.mrf.mxu1 }
 0x1e5   : > { %v1249_v8 = vadd.f32 %v1248_v58, %v1221_v3  ;;  %v1173_v9 = vadd.f32 %v1172_v59, %v2550_v4  ;;  %v1223_v10 = vmul.f32 %v2550_v4, %v2550_v4  ;;  %v2555_v11 = vadd.f32 %v1022_v29, %v951_v7 }
 0x1e6   : > { %v955_v14 = vpop.f32.mrf.mxu0  ;;  %v2569_v23 = vpop.f32.mrf.mxu1 }
 0x1e7   : > { %v1237_v15 = vadd.f32 %v1236_v1, %v1223_v10  ;;  %v1187_v16 = vadd.f32 %v1186_v2, %v2555_v11  ;;  %v1224_v17 = vmul.f32 %v2555_v11, %v2555_v11  ;;  %v2562_v18 = vadd.f32 %v1026_v30, %v955_v14 }
 0x1e8   : > { %v957_v20 = vpop.f32.mrf.mxu0  ;;  %v1095_v30 = vpop.f32.mrf.mxu1 }
 0x1e9   : > { %v1250_v21 = vadd.f32 %v1249_v8, %v1224_v17  ;;  %v1174_v22 = vadd.f32 %v1173_v9, %v2562_v18  ;;  %v1226_v24 = vmul.f32 %v2562_v18, %v2562_v18  ;;  %v2567_v5 = vadd.f32 %v1028_v31, %v957_v20 }
 0x1ea   : > { %v959_v25 = vpop.f32.mrf.mxu0  ;;  %v2582_v40 = vpop.f32.mrf.mxu1 }
 0x1eb   : > { %v1238_v26 = vadd.f32 %v1237_v15, %v1226_v24  ;;  %v1188_v27 = vadd.f32 %v1187_v16, %v2567_v5  ;;  %v1227_v28 = vmul.f32 %v2567_v5, %v2567_v5  ;;  %v2574_v29 = vadd.f32 %v1030_v32, %v959_v25 }
 0x1ec   : > { %v961_v60 = vpop.f32.mrf.mxu0  ;;  %v1098_v48 = vpop.f32.mrf.mxu1 }
 0x1ed   : > { %v1251_v36 = vadd.f32 %v1250_v21, %v1227_v28  ;;  %v1175_v13 = vadd.f32 %v1174_v22, %v2574_v29  ;;  %v1229_v31 = vmul.f32 %v2574_v29, %v2574_v29  ;;  %v2580_v38 = vadd.f32 %v2508_v33, %v961_v60 }
 0x1ee   : > { %v965_v42 = vpop.f32.mrf.mxu0  ;;  %v2597_v54 = vpop.f32.mrf.mxu1 }
 0x1ef   : > { %v1239_v45 = vadd.f32 %v1238_v26, %v1229_v31  ;;  %v1189_v46 = vadd.f32 %v1188_v27, %v2580_v38  ;;  %v1230_v32 = vmul.f32 %v2580_v38, %v2580_v38  ;;  %v2588_v47 = vadd.f32 %v2510_v34, %v965_v42 }
 0x1f0   : > { %v967_v50 = vpop.f32.mrf.mxu0  ;;  %v1103_v61 = vpop.f32.mrf.mxu1 }
 0x1f1   : > { %v1252_v51 = vadd.f32 %v1251_v36, %v1230_v32  ;;  %v1177_v33 = vsel %vm1176_vm0, %v2588_v47, 0.0  ;;  %v1232_v52 = vmul.f32 %v2588_v47, %v2588_v47  ;;  %v2595_v53 = vadd.f32 %v2512_v35, %v967_v50 }
 0x1f2   : > { %v1178_v55 = vadd.f32 %v1177_v33, %v1175_v13  ;;  %v969_v57 = vpop.f32.mrf.mxu0  ;;  %v1104_v6 = vpop.f32.mrf.mxu1 }
 0x1f3   : > { %v1240_v58 = vsel %vm1176_vm0, %v1232_v52, 0.0  ;;  %v1190_v34 = vsel %vm1176_vm0, %v2595_v53, 0.0  ;;  %v1233_v59 = vmul.f32 %v2595_v53, %v2595_v53 }
 0x1f4   : > { %v1179_v0 = vrot.slane %v1178_v55, 4  ;;  %v1241_v1 = vadd.f32 %v1240_v58, %v1239_v45  ;;  %v1191_v2 = vadd.f32 %v1190_v34, %v1189_v46  ;;  %v970_v3 = vpop.f32.mrf.mxu0  ;;  %v1105_v14 = vpop.f32.mrf.mxu1 }
 0x1f5   : > { %v1253_v35 = vsel %vm1176_vm0, %v1233_v59, 0.0  ;;  %v1315_v59 = vlaneseq  ;;  %v2645_v14 = vld [vmem:[%s295_s12] sm:$0x7] }
 0x1f6   : > { %v1180_v7 = vadd.f32 %v1179_v0, %v1178_v55  ;;  %v1242_v8 = vrot.slane %v1241_v1, 4  ;;  %v1192_v9 = vrot.slane %v1191_v2, 4  ;;  %v1254_v10 = vadd.f32 %v1253_v35, %v1252_v51 }
 0x1f8   : > { %v1181_v15 = vrot.slane %v1180_v7, 2  ;;  %v1243_v16 = vadd.f32 %v1242_v8, %v1241_v1  ;;  %v1193_v17 = vadd.f32 %v1192_v9, %v1191_v2  ;;  %v1255_v19 = vrot.slane %v1254_v10, 4 }
 0x1f9   : > { %v2640_v8 = vshrl.u32 %v1315_v59, 7 }
 0x1fa   : > { %v1182_v20 = vadd.f32 %v1181_v15, %v1180_v7  ;;  %v1244_v21 = vrot.slane %v1243_v16, 2  ;;  %v1194_v22 = vrot.slane %v1193_v17, 2  ;;  %v1256_v24 = vadd.f32 %v1255_v19, %v1254_v10 }
 0x1fb   : > { %v2643_v10 = vsub.s32 0, %v2640_v8 }
 0x1fc   : > { %v1183_v25 = vrot.slane %v1182_v20, 1  ;;  %v1245_v26 = vadd.f32 %v1244_v21, %v1243_v16  ;;  %v1195_v27 = vadd.f32 %v1194_v22, %v1193_v17  ;;  %v1257_v28 = vrot.slane %v1256_v24, 2 }
 0x1fd   : > { %v1318_v15 = vrot.slane %v2645_v14, %v2643_v10  ;;  %v1321_v16 = vsub.s32 1, %v2640_v8 }
 0x1fe   : > { %v1184_v30 = vadd.f32 %v1183_v25, %v1182_v20  ;;  %v1246_v60 = vrot.slane %v1245_v26, 1  ;;  %v1196_v36 = vrot.slane %v1195_v27, 1  ;;  %v1258_v13 = vadd.f32 %v1257_v28, %v1256_v24  ;;  %v2650_v20 = vld [vmem:[%s304_s9] sm:$0x7] }
 0x1ff   : > { %v1322_v25 = vrot.slane %v2645_v14, %v1321_v16  ;;  %v1371_v28 = vrot.slane %v2650_v20, %v2643_v10 }
 0x200   : > { %v2605_v31 = vmul.f32 0.020408163, %v1184_v30  ;;  %v1247_v42 = vadd.f32 %v1246_v60, %v1245_v26  ;;  %v1197_v45 = vadd.f32 %v1196_v36, %v1195_v27  ;;  %v1259_v46 = vrot.slane %v1258_v13, 1 }
 0x202   : > { %v1274_v32 = vmul.f32 0.020408163, %v1247_v42  ;;  %v1277_v48 = vmul.f32 %v2605_v31, %v2605_v31  ;;  %v1292_v50 = vsub.f32 %v2516_v39, %v2605_v31  ;;  %v1295_v51 = vsub.f32 %v2520_v43, %v2605_v31 }
 0x203   : > { %v1298_v33 = vsub.f32 %v2538_v56, %v2605_v31  ;;  %v1301_v52 = vsub.f32 %v2550_v4, %v2605_v31  ;;  %v1304_v55 = vsub.f32 %v2562_v18, %v2605_v31  ;;  %v1307_v57 = vsub.f32 %v2574_v29, %v2605_v31 }
 0x204   : > { %v1280_v58 = vsub.f32 %v1274_v32, %v1277_v48  ;;  %v2621_v34 = vmul.f32 0.020408163, %v1197_v45  ;;  %v1260_v39 = vadd.f32 %v1259_v46, %v1258_v13  ;;  %v1310_v36 = vsub.f32 %v2588_v47, %v2605_v31 }
 0x205   : > { %v1375_v13 = vrot.slane %v2650_v20, %v1321_v16 }
 0x206   : > { %v1283_v61 = vmax.f32 %v1280_v58, 0.0  ;;  %v1275_v43 = vmul.f32 0.020408163, %v1260_v39  ;;  %v1278_v56 = vmul.f32 %v2621_v34, %v2621_v34  ;;  %v1293_v4 = vsub.f32 %v2518_v41, %v2621_v34 }
 0x207   : > { %v1296_v18 = vsub.f32 %v2530_v49, %v2621_v34  ;;  %v1299_v29 = vsub.f32 %v2543_v62, %v2621_v34  ;;  %v1302_v0 = vsub.f32 %v2555_v11, %v2621_v34  ;;  %v1305_v1 = vsub.f32 %v2567_v5, %v2621_v34 }
 0x208   : > { %v1286_v2 = vadd.f32 1e-05, %v1283_v61  ;;  %v1281_v3 = vsub.f32 %v1275_v43, %v1278_v56  ;;  %v1308_v35 = vsub.f32 %v2580_v38, %v2621_v34  ;;  %v1311_v6 = vsub.f32 %v2595_v53, %v2621_v34 }
 0x20a   : > { %1924 = vrsqrt.f32 %v1286_v2  ;;  %v1284_v7 = vmax.f32 %v1281_v3, 0.0 }
 0x20c   : > { %v1287_v9 = vadd.f32 1e-05, %v1284_v7 }
 0x20e   : > { %1926 = vrsqrt.f32 %v1287_v9 }
 0x216   : > { %v1714_v17 = vpop.f32.mrf.mxu0 }
 0x217   : > { %v1925_v19 = vpop.eup %1924  ;;  %v2652_v21 = vpop.f32.mrf.mxu1  ;;  %v2672_v31 = vadd.f32 %v1714_v17, %v2545_v63 }
 0x218   : > { %v1330_v22 = vmul.f32 %v1925_v19, %v1318_v15  ;;  %v1141_v24 = vpop.f32.mrf.mxu0  ;;  %v1166_v16 = vadd.f32 %v2652_v21, %v2597_v54 }
 0x219   : > { %v2656_v26 = vpop.f32.mrf.mxu1 }
 0x21a   : > { %v1336_v27 = vrot.slane %v1330_v22, %v2643_v10  ;;  %v1715_v30 = vpop.f32.mrf.mxu0 }
 0x21b   : > { %v1927_v60 = vpop.eup %1926  ;;  %v1719_v42 = vpop.f32.mrf.mxu1 }
 0x21c   : > { %v1345_v45 = vmul.f32 %v1336_v27, %v1292_v50  ;;  %v1348_v46 = vmul.f32 %v1336_v27, %v1295_v51  ;;  %v1351_v32 = vmul.f32 %v1336_v27, %v1298_v33  ;;  %v1354_v48 = vmul.f32 %v1336_v27, %v1301_v52  ;;  %v1144_v43 = vpop.f32.mrf.mxu0 }
 0x21d   : > { %v1357_v58 = vmul.f32 %v1336_v27, %v1304_v55  ;;  %v1360_v39 = vmul.f32 %v1336_v27, %v1307_v57  ;;  %v1363_v59 = vmul.f32 %v1336_v27, %v1310_v36  ;;  %v1331_v61 = vmul.f32 %v1927_v60, %v1322_v25 }
 0x21e   : > { %v1383_v56 = vadd.f32 %v1371_v28, %v1345_v45  ;;  %v1386_v2 = vadd.f32 %v1371_v28, %v1348_v46  ;;  %v1389_v3 = vadd.f32 %v1371_v28, %v1351_v32  ;;  %v1392_v7 = vadd.f32 %v1371_v28, %v1354_v48 }
 0x21f   : > { %v1395_v9 = vadd.f32 %v1371_v28, %v1357_v58  ;;  %v1398_v15 = vadd.f32 %v1371_v28, %v1360_v39  ;;  %v1401_v19 = vadd.f32 %v1371_v28, %v1363_v59  ;;  %v1340_v47 = vrot.slane %v1331_v61, %v2643_v10 }
 0x220   : > { %1404 = vst [vmem:[%s2665_s13] sm:$0xff] %v1383_v56  ;;  %1407 = vst [vmem:[%s2665_s13 + $0x18] sm:$0xff] %v1386_v2  ;;  %v2675_v50 = vadd.f32 %v1141_v24, %v2514_v37  ;;  %v2678_v51 = vadd.f32 %v1715_v30, %v2557_v12  ;;  %v2681_v33 = vadd.f32 %v1144_v43, %v2522_v44  ;;  %v1203_v30 = vsel %vm1176_vm0, %v1166_v16, 0.0 }
 0x221   : > { %1410 = vst [vmem:[%s2665_s13 + $0x30] sm:$0xff] %v1389_v3  ;;  %1413 = vst [vmem:[%s2665_s13 + $0x48] sm:$0xff] %v1392_v7  ;;  %v1346_v52 = vmul.f32 %v1340_v47, %v1293_v4  ;;  %v1349_v63 = vmul.f32 %v1340_v47, %v1296_v18  ;;  %v1352_v37 = vmul.f32 %v1340_v47, %v1299_v29 }
 0x222   : > { %1416 = vst [vmem:[%s2665_s13 + $0x60] sm:$0xff] %v1395_v9  ;;  %1419 = vst [vmem:[%s2665_s13 + $0x78] sm:$0xff] %v1398_v15  ;;  %v1355_v44 = vmul.f32 %v1340_v47, %v1302_v0  ;;  %v1358_v41 = vmul.f32 %v1340_v47, %v1305_v1  ;;  %v1361_v49 = vmul.f32 %v1340_v47, %v1308_v35  ;;  %v1160_v0 = vpop.f32.mrf.mxu1 }
 0x223   : > { %1422 = vst [vmem:[%s2665_s13 + $0x90] sm:$0x1] %v1401_v19  ;;  %v1364_v62 = vmul.f32 %v1340_v47, %v1311_v6  ;;  %v1198_v12 = vadd.f32 %v2681_v33, %v2675_v50  ;;  %v1384_v11 = vadd.f32 %v1375_v13, %v1346_v52  ;;  %v1387_v55 = vadd.f32 %v1375_v13, %v1349_v63 }
 0x224   : > { %v1390_v57 = vadd.f32 %v1375_v13, %v1352_v37  ;;  %v1393_v5 = vadd.f32 %v1375_v13, %v1355_v44  ;;  %v1396_v4 = vadd.f32 %v1375_v13, %v1358_v41  ;;  %v1399_v18 = vadd.f32 %v1375_v13, %v1361_v49 }
 0x225   : > { %v1402_v29 = vadd.f32 %v1375_v13, %v1364_v62  ;;  %v1199_v38 = vadd.f32 %v1198_v12, %v2672_v31  ;;  %1405 = vst [vmem:[%s2665_s13 + $0x8] sm:$0xff] %v1384_v11  ;;  %1408 = vst [vmem:[%s2665_s13 + $0x20] sm:$0xff] %v1387_v55  ;;  %v1216_v53 = vmul.f32 %v2675_v50, %v2675_v50  ;;  %v1325_v41 = vsub.s32 2, %v2640_v8 }
 0x226   : > { %1411 = vst [vmem:[%s2665_s13 + $0x38] sm:$0xff] %v1390_v57  ;;  %1414 = vst [vmem:[%s2665_s13 + $0x50] sm:$0xff] %v1393_v5  ;;  %v1219_v34 = vmul.f32 %v2681_v33, %v2681_v33  ;;  %v1158_v1 = vadd.f32 %v2656_v26, %v2569_v23  ;;  %v1222_v6 = vmul.f32 %v2672_v31, %v2672_v31 }
 0x227   : > { %1417 = vst [vmem:[%s2665_s13 + $0x68] sm:$0xff] %v1396_v4  ;;  %1420 = vst [vmem:[%s2665_s13 + $0x80] sm:$0xff] %v1399_v18  ;;  %v1200_v35 = vadd.f32 %v1199_v38, %v2678_v51  ;;  %v1161_v22 = vadd.f32 %v1160_v0, %v2582_v40  ;;  %v1225_v25 = vmul.f32 %v2678_v51, %v2678_v51 }
 0x228   : > { %1423 = vst [vmem:[%s2665_s13 + $0x98] sm:$0x1] %v1402_v29  ;;  %v1261_v17 = vadd.f32 %v1219_v34, %v1216_v53  ;;  %v1228_v23 = vmul.f32 %v1158_v1, %v1158_v1  ;;  %v1234_v60 = vmul.f32 %v1166_v16, %v1166_v16  ;;  %v1326_v49 = vrot.slane %v2645_v14, %v1325_v41 }
 0x229   : > { %v1201_v24 = vadd.f32 %v1200_v35, %v1158_v1  ;;  %v1231_v13 = vmul.f32 %v1161_v22, %v1161_v22  ;;  %v1379_v11 = vrot.slane %v2650_v20, %v1325_v41 }
 0x22a   : > { %v1262_v27 = vadd.f32 %v1261_v17, %v1222_v6  ;;  %v1266_v54 = vsel %vm1176_vm0, %v1234_v60, 0.0 }
 0x22b   : > { %v1202_v28 = vadd.f32 %v1201_v24, %v1161_v22 }
 0x22c   : > { %v1263_v26 = vadd.f32 %v1262_v27, %v1225_v25 }
 0x22d   : > { %v1204_v36 = vadd.f32 %v1203_v30, %v1202_v28 }
 0x22e   : > { %v1264_v42 = vadd.f32 %v1263_v26, %v1228_v23 }
 0x22f   : > { %v1205_v45 = vrot.slane %v1204_v36, 4 }
 0x230   : > { %v1265_v46 = vadd.f32 %v1264_v42, %v1231_v13 }
 0x231   : > { %v1206_v21 = vadd.f32 %v1205_v45, %v1204_v36 }
 0x232   : > { %v1267_v40 = vadd.f32 %v1266_v54, %v1265_v46 }
 0x233   : > { %v1207_v32 = vrot.slane %v1206_v21, 2 }
 0x234   : > { %v1268_v48 = vrot.slane %v1267_v40, 4 }
 0x235   : > { %v1208_v58 = vadd.f32 %v1207_v32, %v1206_v21 }
 0x236   : > { %v1269_v39 = vadd.f32 %v1268_v48, %v1267_v40 }
 0x237   : > { %v1209_v59 = vrot.slane %v1208_v58, 1 }
 0x238   : > { %v1270_v61 = vrot.slane %v1269_v39, 2 }
 0x239   : > { %v1210_v43 = vadd.f32 %v1209_v59, %v1208_v58 }
 0x23a   : > { %v1271_v56 = vadd.f32 %v1270_v61, %v1269_v39 }
 0x23b   : > { %v1213_v2 = vmul.f32 0.020408163, %v1210_v43 }
 0x23c   : > { %v1272_v3 = vrot.slane %v1271_v56, 1 }
 0x23d   : > { %v1294_v7 = vsub.f32 %v2675_v50, %v1213_v2  ;;  %v1300_v9 = vsub.f32 %v2672_v31, %v1213_v2  ;;  %v1279_v19 = vmul.f32 %v1213_v2, %v1213_v2  ;;  %v1303_v47 = vsub.f32 %v2678_v51, %v1213_v2 }
 0x23e   : > { %v1273_v15 = vadd.f32 %v1272_v3, %v1271_v56  ;;  %v1297_v50 = vsub.f32 %v2681_v33, %v1213_v2  ;;  %v1306_v51 = vsub.f32 %v1158_v1, %v1213_v2  ;;  %v1309_v55 = vsub.f32 %v1161_v22, %v1213_v2 }
 0x23f   : > { %v1312_v57 = vsub.f32 %v1166_v16, %v1213_v2 }
 0x240   : > { %v1276_v52 = vmul.f32 0.020408163, %v1273_v15 }
 0x242   : > { %v1282_v63 = vsub.f32 %v1276_v52, %v1279_v19 }
 0x244   : > { %v1285_v37 = vmax.f32 %v1282_v63, 0.0 }
 0x246   : > { %v1288_v44 = vadd.f32 1e-05, %v1285_v37 }
 0x248   : > { %1928 = vrsqrt.f32 %v1288_v44 }
 0x255   : > { %v1929_v62 = vpop.eup %1928 }
 0x256   : > { %v1332_v12 = vmul.f32 %v1929_v62, %v1326_v49 }
 0x258   : > { %v1344_v31 = vrot.slane %v1332_v12, %v2643_v10 }
 0x25a   : > { %v1347_v5 = vmul.f32 %v1344_v31, %v1294_v7  ;;  %v1350_v4 = vmul.f32 %v1344_v31, %v1297_v50  ;;  %v1353_v8 = vmul.f32 %v1344_v31, %v1300_v9  ;;  %v1356_v14 = vmul.f32 %v1344_v31, %v1303_v47 }
 0x25b   : > { %v1359_v18 = vmul.f32 %v1344_v31, %v1306_v51  ;;  %v1362_v29 = vmul.f32 %v1344_v31, %v1309_v55  ;;  %v1365_v33 = vmul.f32 %v1344_v31, %v1312_v57 }
 0x25c   : > { %v1385_v10 = vadd.f32 %v1379_v11, %v1347_v5  ;;  %v1388_v20 = vadd.f32 %v1379_v11, %v1350_v4  ;;  %v1391_v38 = vadd.f32 %v1379_v11, %v1353_v8  ;;  %v1394_v53 = vadd.f32 %v1379_v11, %v1356_v14 }
 0x25d   : > { %v1397_v34 = vadd.f32 %v1379_v11, %v1359_v18  ;;  %v1400_v0 = vadd.f32 %v1379_v11, %v1362_v29  ;;  %v1403_v1 = vadd.f32 %v1379_v11, %v1365_v33 }
 0x25e   : > { %1406 = vst [vmem:[%s2665_s13 + $0x10] sm:$0xff] %v1385_v10  ;;  %1409 = vst [vmem:[%s2665_s13 + $0x28] sm:$0xff] %v1388_v20 }
 0x25f   : > { %1412 = vst [vmem:[%s2665_s13 + $0x40] sm:$0xff] %v1391_v38  ;;  %1415 = vst [vmem:[%s2665_s13 + $0x58] sm:$0xff] %v1394_v53 }
 0x260   : > { %1418 = vst [vmem:[%s2665_s13 + $0x70] sm:$0xff] %v1397_v34  ;;  %1421 = vst [vmem:[%s2665_s13 + $0x88] sm:$0xff] %v1400_v0 }
 0x261   : > { %1424 = vst [vmem:[%s2665_s13 + $0xa0] sm:$0x1] %v1403_v1 }
 0x262   : > { %2079 = shalt.err (!%p2076_p4)
}
 0x263   : > { %s2080_s25 = scalar_lea.hbm %s2746_s11, 2688  ;;  %s2084_s7 = scalar_lea.hbm %s2802_s5, 16128 }
 0x264   : > { %p2081_p13 = scmp.ne.s32.totalorder %s2746_s11, %s2080_s25  ;;  %p2085_p1 = scmp.lt.s32.totalorder %s2746_s11, %s2802_s5 }
 0x265   : > { %p2086_p0 = scmp.lt.s32.totalorder %s2084_s7, %s2080_s25 }
 0x266   : > { %p2082_p11 = pnand %p2081_p13, %p2842_p3 }
 0x267   : > { %p2087_p6 = por %p2086_p0, %p2085_p1 }
 0x268   : > { %p2083_p2 = pneg %p2082_p11 }
 0x26a   : > { %p2088_p7 = pnand %p2087_p6, %p2083_p2 }
 0x26c   : > { %2091 = shalt.err (!%p2088_p7)
}
 0x26d   : > { %s2150_s29 = smov 384   ;;  %s2151_s12 = smov 2304  }
 0x26e   : > { %s2152_s9 = smov 24  }
 0x26f   : > { %1757 = dma.vmem_to_hbm [thread:$0]  (%p2842_p3), %s2748_s2, 2688, %s2746_s11, %s1426_s8, %s2150_s29, %s2151_s12, %s2152_s9  }
 0x270 PF: > { %p1786_p8 = scmp.ge.s32.totalorder %s2138_s21, 2  ;;  %s1454_s26 = sand.u32 1, %s2126_s18  }
 0x271   : > { %p2843_p9 = scmp.ne.s32.totalorder %s2823_s6, 0  ;;  %s1455_s13 = scalar_lea.sflag [#allocation4], %s1454_s26 }
 0x273   : > { %p1777_p10 = pnand %p1786_p8, %p2843_p9 }
 0x275   : > { %p1778_p5 = pneg %p1777_p10 }
 0x277   : > { %2121 = dma.done.wait (%p1778_p5), %s1455_s13, 2688  }
 0x278   : > { %2123 = vsyncadd (%p1778_p5), %s1455_s13, 4294964608  ;;  %s2844_s21 = sld [smem:[#allocation16_spill]]  ;;  %s2847_s18 = smov %s2130_s19 }
 0x279   : > { %s2845_s0 = sld [smem:[#allocation15_spill]] }
 0x27a   : > { %s2846_s20 = sld [smem:[#allocation17_spill]] }
 0x27e   : > { %p17_p12 = scmp.ge.s32.totalorder %s2844_s21, 8  }
 0x27f   : > { %s2848_s19 = smov %s2845_s0 }
 0x280   :  { %19 = sbr.rel (!%p17_p12) target bundleno = 8 (0x8), region = 114 }
 0x285   :  { %1460 = vsyncpa [#allocation3], 1 }
 0x286   :  { %1462 = vsyncpa [#allocation3 + $0x1], 1 }
 0x287   :  { %1463 = vsyncpa [#allocation6], 1 }
 0x288   :  { %1464 = vsyncpa [#allocation4], 1 }
 0x289   :  { %1466 = vsyncpa [#allocation4 + $0x1], 1 }

</bundles_post_ra>
